<compile_context>
chip_gen: v5e
topology: v5e:2x2
jax: 0.10.0
libtpu: 0.0.40
codegen_flags: <defaults>
</compile_context>

<pallas_src>
import functools
import math

import jax
import jax.numpy as jnp
from jax.experimental import pallas as pl
from jax.experimental.pallas import tpu as pltpu


def _fixed_pos_emb_kernel(freq_ref, const_ref, o_ref, *, pos_scale):
    # freq_ref:  (1, W) f32  — inv_freq tiled across the packed lane axis
    # const_ref: (1, W) f32  — per-lane constant: lane_pos*inv_freq + {0, pi/2}
    # o_ref:     (ts, W)     — tile of the (packed) output embedding
    ts, _ = o_ref.shape
    row0 = pl.program_id(0) * ts

    # Absolute (packed) row index as a (ts, 1) f32 column; broadcasts over lanes.
    pos = (jax.lax.broadcasted_iota(jnp.int32, (ts, 1), 0) + row0).astype(jnp.float32)
    if pos_scale != 1.0:
        pos = pos * pos_scale                     # k positions per packed row

    # phase[r, c] = position(r, c) * inv_freq[c % dim] + offset[c % dim]
    phase = pos * freq_ref[...] + const_ref[...]

    # cos(x) == sin(x + pi/2): one transcendental per element, no select.
    o_ref[...] = jnp.sin(phase).astype(o_ref.dtype)


def fixed_positional_embedding(x, dim, max_seq_len, *, tile_rows=None):
    """Returns emb[None, :x.shape[1], :] cast to x.dtype, shape (1, seq, dim)."""
    _, S, _ = x.shape
    assert dim % 2 == 0, "dim must be even"
    assert S <= max_seq_len, "sequence length exceeds max_seq_len"
    half = dim // 2
    out_dtype = x.dtype
    out_bytes = jnp.dtype(out_dtype).itemsize

    # Frequency row and phase-offset row (cos half gets +pi/2), computed once (f32).
    inv_freq = 1.0 / (10000.0 ** (jnp.arange(0, dim, 2, dtype=jnp.float32) / dim))
    freq_dim = jnp.concatenate([inv_freq, inv_freq])                         # (dim,)
    offs_dim = jnp.concatenate(
        [jnp.zeros((half,), jnp.float32),
         jnp.full((half,), jnp.float32(math.pi / 2.0))])                     # (dim,)

    # Lane-dense packing: fold k consecutive positions into the lane axis when
    # dim is not already a multiple of 128 (avoids masked partial stores).
    k = 1
    if dim % 128 != 0:
        k_need = 128 // math.gcd(dim, 128)
        if S % k_need == 0:
            k = k_need
    W = k * dim
    S_p = S // k

    freq_row = jnp.tile(freq_dim, k).reshape(1, W)
    lane_pos = jnp.repeat(jnp.arange(k, dtype=jnp.float32), dim)             # (W,)
    const_row = (lane_pos * jnp.tile(freq_dim, k) + jnp.tile(offs_dim, k)).reshape(1, W)

    # Tile sizing: ~4 MiB of f32 working set per tile, rows a multiple of 8,
    # and (when the problem is big enough) at least two grid steps so both
    # v7x TensorCores participate via the "parallel" axis.
    if tile_rows is None:
        tile_rows = max(8, ((4 * 1024 * 1024) // (W * 4)) // 8 * 8)
        tile_rows = min(tile_rows, 2048)
    if S_p >= 16:
        half_rows = (((S_p + 1) // 2) + 7) // 8 * 8
        tile_rows = min(tile_rows, half_rows)
    ts = tile_rows if S_p >= tile_rows else S_p          # small-S: full-extent block
    grid = (pl.cdiv(S_p, ts),)                           # partial tail handled by Pallas

    cost = pl.CostEstimate(
        flops=3 * S * dim,
        transcendentals=S * dim,
        bytes_accessed=S * dim * out_bytes + 2 * W * 4,
    )

    out = pl.pallas_call(
        functools.partial(_fixed_pos_emb_kernel, pos_scale=float(k)),
        out_shape=jax.ShapeDtypeStruct((S_p, W), out_dtype),
        grid_spec=pltpu.PrefetchScalarGridSpec(
            num_scalar_prefetch=0,
            grid=grid,
            in_specs=[
                pl.BlockSpec((1, W), lambda i: (0, 0)),   # freq row (resident)
                pl.BlockSpec((1, W), lambda i: (0, 0)),   # offset row (resident)
            ],
            out_specs=pl.BlockSpec((ts, W), lambda i: (i, 0)),
        ),
        compiler_params=pltpu.CompilerParams(
            dimension_semantics=("parallel",),
            vmem_limit_bytes=32 * 1024 * 1024,
        ),
        cost_estimate=cost,
    )(freq_row, const_row)

    # Row-major (S_p, k*dim) flattens identically to (S, dim).
    return out.reshape(1, S, dim)


def _reference(x, dim, max_seq_len):
    inv_freq = 1.0 / (10000.0 ** (jnp.arange(0, dim, 2, dtype=jnp.float32) / dim))
    position = jnp.arange(0, max_seq_len, dtype=jnp.float32)
    sinusoid = jnp.einsum("i,j->ij", position, inv_freq)
    emb = jnp.concatenate([jnp.sin(sinusoid), jnp.cos(sinusoid)], axis=-1)
    return emb[None, : x.shape[1], :].astype(x.dtype)


if __name__ == "__main__":
    key = jax.random.PRNGKey(0)

    # Case 1: small dim (packed lane-dense path, k=4), f32.
    B, S, DIM, MAX_SEQ = 2, 8, 32, 16
    x = jax.random.normal(key, (B, S, DIM), dtype=jnp.float32)
    out = jax.block_until_ready(fixed_positional_embedding(x, DIM, MAX_SEQ))
    ref = _reference(x, DIM, MAX_SEQ)
    assert out.shape == (1, S, DIM)
    assert out.dtype == x.dtype
    assert jnp.allclose(out, ref, atol=1e-4, rtol=1e-4)

    # Case 2: dim multiple of 128 (k=1 path, multi-tile grid, tail tile), bf16.
    B2, S2, DIM2, MAX_SEQ2 = 1, 24, 128, 32
    x2 = jax.random.normal(key, (B2, S2, DIM2), dtype=jnp.bfloat16)
    out2 = jax.block_until_ready(fixed_positional_embedding(x2, DIM2, MAX_SEQ2))
    ref2 = _reference(x2, DIM2, MAX_SEQ2)
    assert out2.shape == (1, S2, DIM2)
    assert out2.dtype == x2.dtype
    assert jnp.allclose(out2.astype(jnp.float32), ref2.astype(jnp.float32),
                        atol=2e-2, rtol=2e-2)

    print("KERNEL_OK")
</pallas_src>

<mosaic_0001>
module attributes {stable_mosaic.version = 11 : i64} {
  func.func @_fixed_pos_emb_kernel(%arg0: i32, %arg1: memref<1x128xf32, #tpu.memory_space<vmem>>, %arg2: memref<1x128xf32, #tpu.memory_space<vmem>>, %arg3: memref<2x128xf32, #tpu.memory_space<vmem>>) attributes {dimension_semantics = [#tpu.dimension_semantics<parallel>], iteration_bounds = array<i64: 1>, scalar_prefetch = 0 : i64, scratch_operands = 0 : i64, tpu.core_type = #tpu.core_type<tc>, window_params = [{pipeline_mode = #tpu.pipeline_mode<synchronous>, transform_indices = @transform_0, window_bounds = array<i64: 1, 128>}, {pipeline_mode = #tpu.pipeline_mode<synchronous>, transform_indices = @transform_1, window_bounds = array<i64: 1, 128>}, {transform_indices = @transform_2, window_bounds = array<i64: 2, 128>}]} {
    %c2_i32 = arith.constant 2 : i32
    %0 = arith.muli %arg0, %c2_i32 : i32
    %1 = tpu.iota {dimensions = array<i32: 0>} : vector<2x1xi32>
    %2 = vector.broadcast %0 : i32 to vector<2x1xi32>
    %3 = arith.addi %1, %2 : vector<2x1xi32>
    %4 = arith.sitofp %3 : vector<2x1xi32> to vector<2x1xf32>
    %cst = arith.constant 4.000000e+00 : f32
    %5 = vector.broadcast %cst : f32 to vector<2x1xf32>
    %6 = arith.mulf %4, %5 : vector<2x1xf32>
    %c0 = arith.constant 0 : index
    %c0_0 = arith.constant 0 : index
    %7 = vector.load %arg1[%c0, %c0_0] : memref<1x128xf32, #tpu.memory_space<vmem>>, vector<1x128xf32>
    %8 = vector.broadcast %6 : vector<2x1xf32> to vector<2x128xf32>
    %9 = vector.broadcast %7 : vector<1x128xf32> to vector<2x128xf32>
    %10 = arith.mulf %8, %9 : vector<2x128xf32>
    %c0_1 = arith.constant 0 : index
    %c0_2 = arith.constant 0 : index
    %11 = vector.load %arg2[%c0_1, %c0_2] : memref<1x128xf32, #tpu.memory_space<vmem>>, vector<1x128xf32>
    %12 = vector.broadcast %11 : vector<1x128xf32> to vector<2x128xf32>
    %13 = arith.addf %10, %12 : vector<2x128xf32>
    %14 = math.sin %13 : vector<2x128xf32>
    %c0_3 = arith.constant 0 : index
    %c0_4 = arith.constant 0 : index
    %15 = vector.load %arg3[%c0_3, %c0_4] : memref<2x128xf32, #tpu.memory_space<vmem>>, vector<2x128xf32>
    tpu.vector_store %arg3[%c0_3, %c0_4], %14 {strides = array<i32>} : memref<2x128xf32, #tpu.memory_space<vmem>>, vector<2x128xf32>,
    return
  }
  func.func @transform_0(%arg0: i32) -> (i32, i32) {
    %c0_i32 = arith.constant 0 : i32
    %c0_i32_0 = arith.constant 0 : i32
    %c0_i32_1 = arith.constant 0 : i32
    return %c0_i32, %c0_i32_0 : i32, i32
  }
  func.func @transform_1(%arg0: i32) -> (i32, i32) {
    %c0_i32 = arith.constant 0 : i32
    %c0_i32_0 = arith.constant 0 : i32
    %c0_i32_1 = arith.constant 0 : i32
    return %c0_i32, %c0_i32_0 : i32, i32
  }
  func.func @transform_2(%arg0: i32) -> (i32, i32) {
    %c0_i32 = arith.constant 0 : i32
    %c0_i32_0 = arith.constant 0 : i32
    return %arg0, %c0_i32 : i32, i32
  }
}

</mosaic_0001>

<bundles_post_ra>
// kernel: tpu_custom_call.1
= control target key start
LH: loop header
LB: loop body
LE: loop exit
PB: predicated region body
PF: predicated region fallthrough
CT: control target
= control target key end

     0   :  { %7 = vsyncpa [#allocation3], 0  ;;  %s404_s0 = inlined_call_operand.hbm [shape: f32[1,128], index: 0, kind: input, shape index: {}]   ;;  %s405_s1 = inlined_call_operand.hbm [shape: f32[1,128], index: 1, kind: input, shape index: {}]   ;;  %s406_s2 = inlined_call_operand.hbm [shape: f32[2,128], index: 2, kind: output, shape index: {}]  }
   0x1   :  { %8 = vsyncpa [#allocation6], 0 }
   0x2   :  { %9 = vsyncpa [#allocation4], 0  ;;  %s15_s11 = sshll.u32 %s404_s0, 4  ;;  %s324_s12 = smov [#allocation2]   ;;  %s16_s11 = int_to_ptr.hbm [resolvable:$true] %s15_s11 }
   0x3   :  { %s17_s13 = sshll.u32 %s324_s12, 4  ;;  %s26_s16 = sshll.u32 %s405_s1, 4  ;;  %s18_s13 = int_to_ptr.vmem [resolvable:$true] %s17_s13  ;;  %s27_s16 = int_to_ptr.hbm [resolvable:$true] %s26_s16 }
   0x4   :  { %20 = dma.hbm_to_vmem [thread:$0]  %s16_s11, 16, %s18_s13, [#allocation3]  }
   0x5   :  { %s325_s17 = smov [#allocation5]  }
   0x6   :  { %s28_s18 = sshll.u32 %s325_s17, 4  ;;  %s29_s18 = int_to_ptr.vmem [resolvable:$true] %s28_s18 }
   0x7   :  { %31 = dma.hbm_to_vmem [thread:$0]  %s27_s16, 16, %s29_s18, [#allocation6]  }
   0x8   :  { %318 = dma.done.wait [#allocation3], 16  }
   0x9   :  { %319 = vsyncadd [#allocation3], 4294967280 }
   0xa   :  { %320 = dma.done.wait [#allocation6], 16  }
   0xb   :  { %321 = vsyncadd [#allocation6], 4294967280  ;;  %v41_v0 = vlaneseq  ;;  %v244_v4 = vld [vmem:[#allocation2] ss:$0 sm:$0xff]  ;;  %v245_v5 = vld [vmem:[#allocation5] ss:$0 sm:$0xff] }
   0xc   :  { %v326_v19 = vmov 683565275   ;;  %v327_v21 = vmov 2475754826   ;;  %v328_v23 = vmov 2131351028  }
   0xd   :  { %v42_v1 = vshrl.u32 %v41_v0, 7  ;;  %v329_v25 = vmov 2102212464   ;;  %v330_v27 = vmov 920167782   ;;  %s333_s0 = smov [#allocation7]  }
   0xe   :  { %v331_v33 = vmov 1326507024   ;;  %s218_s1 = sshll.u32 %s333_s0, 4  ;;  %s220_s21 = sshll.u32 %s406_s2, 4  ;;  %s219_s1 = int_to_ptr.vmem [resolvable:$true] %s218_s1  ;;  %s221_s21 = int_to_ptr.hbm [resolvable:$true] %s220_s21 }
   0xf   :  { %v45_v2 = vcvt.s32.f32 %v42_v1 }
  0x11   :  { %v46_v3 = vmul.f32 4.0, %v45_v2 }
  0x13   :  { %v51_v6 = vmul.f32 %v244_v4, %v46_v3 }
  0x15   :  { %v355_v7 = vadd.f32 %v245_v5, %v51_v6 }
  0x17   :  { %v60_v8 = vand.u32 2139095040, %v355_v7  ;;  %v57_v10 = vand.u32 2147483647, %v355_v7  ;;  %vm59_vm12 = vcmp.lt.s32.totalorder %v355_v7, 0 }
  0x19   :  { %v61_v9 = vshrl.u32 %v60_v8, 23  ;;  %v64_v13 = vand.u32 8388607, %v57_v10  ;;  %v332_v8 = vmov 0   ;;  %vm58_vm13 = vcmp.le.f32.partialorder %v57_v10, 0.7853982 }
  0x1b   :  { %v231_v11 = vadd.s32 4294967169, %v61_v9  ;;  %v65_v16 = vor.u32 8388608, %v64_v13 }
  0x1d   :  { %v67_v12 = vadd.s32 1, %v231_v11  ;;  %v364_v35 = vshll.u32 %v65_v16, 8 }
  0x1f   :  { %vm68_vm0 = vcmp.gt.s32.totalorder %v67_v12, 0  ;;  %v106_v47 = vand.u32 65535, %v364_v35  ;;  %v107_v48 = vshrl.u32 %v364_v35, 16 }
  0x20   :  { %v69_v14 = vsel %vm68_vm0, %v67_v12, 0 }
  0x21   :  { %v71_v15 = vand.u32 31, %v69_v14  ;;  %v361_v17 = vshrl.u32 %v69_v14, 5 }
  0x23   :  { %v72_v18 = vsub.s32 32, %v71_v15  ;;  %v74_v20 = vshll.u32 %v326_v19, %v71_v15  ;;  %v77_v22 = vshll.u32 %v327_v21, %v71_v15  ;;  %v80_v24 = vshll.u32 %v328_v23, %v71_v15 }
  0x24   :  { %v83_v26 = vshll.u32 %v329_v25, %v71_v15  ;;  %v86_v28 = vshll.u32 %v330_v27, %v71_v15  ;;  %vm89_vm1 = vcmp.lt.s32.totalorder %v361_v17, 1  ;;  %vm92_vm2 = vcmp.lt.s32.totalorder %v361_v17, 4 }
  0x25   :  { %v75_v29 = vshrl.u32 %v327_v21, %v72_v18  ;;  %v78_v30 = vshrl.u32 %v328_v23, %v72_v18  ;;  %v81_v31 = vshrl.u32 %v329_v25, %v72_v18  ;;  %v84_v32 = vshrl.u32 %v330_v27, %v72_v18 }
  0x26   :  { %v87_v34 = vshrl.u32 %v331_v33, %v72_v18  ;;  %vm91_vm3 = vcmp.lt.s32.totalorder %v361_v17, 3  ;;  %vm90_vm4 = vcmp.lt.s32.totalorder %v361_v17, 2  ;;  %v73_v55 = vshrl.u32 %v326_v19, %v72_v18 }
  0x27   :  { %v76_v36 = vor.u32 %v75_v29, %v74_v20  ;;  %v79_v37 = vor.u32 %v78_v30, %v77_v22  ;;  %v82_v38 = vor.u32 %v81_v31, %v80_v24  ;;  %v85_v39 = vor.u32 %v84_v32, %v83_v26 }
  0x28   :  { %v88_v40 = vor.u32 %v87_v34, %v86_v28 }
  0x29   :  { %v97_v41 = vsel %vm89_vm1, %v76_v36, %v79_v37  ;;  %v101_v42 = vsel %vm89_vm1, %v79_v37, %v82_v38  ;;  %v98_v43 = vsel %vm92_vm2, %v85_v39, 920167782  ;;  %v93_v4 = vsel %vm89_vm1, %v73_v55, %v76_v36 }
  0x2a   :  { %v102_v44 = vsel %vm92_vm2, %v88_v40, 1326507024  ;;  %v99_v45 = vsel %vm91_vm3, %v82_v38, %v98_v43  ;;  %v94_v6 = vsel %vm92_vm2, %v82_v38, 2102212464  ;;  %vm200_vm1 = vweird.f32 %v355_v7 }
  0x2b   :  { %v103_v46 = vsel %vm91_vm3, %v85_v39, %v102_v44  ;;  %v100_v49 = vsel %vm90_vm4, %v97_v41, %v99_v45  ;;  %v95_v19 = vsel %vm91_vm3, %v79_v37, %v94_v6 }
  0x2c   :  { %v104_v50 = vsel %vm90_vm4, %v101_v42, %v103_v46  ;;  %v130_v53 = vand.u32 65535, %v100_v49  ;;  %v131_v54 = vshrl.u32 %v100_v49, 16  ;;  %v96_v27 = vsel %vm90_vm4, %v93_v4, %v95_v19 }
  0x2d   :  { %v108_v51 = vand.u32 65535, %v104_v50  ;;  %v109_v52 = vshrl.u32 %v104_v50, 16  ;;  %v150_v31 = vmul.u32 %v364_v35, %v96_v27 }
  0x2e   :  { %v132_v59 = vmul.u32 %v130_v53, %v106_v47  ;;  %v133_v60 = vmul.u32 %v131_v54, %v106_v47  ;;  %v134_v61 = vmul.u32 %v130_v53, %v107_v48  ;;  %v135_v1 = vmul.u32 %v131_v54, %v107_v48 }
  0x2f   :  { %v110_v56 = vmul.u32 %v108_v51, %v106_v47  ;;  %v111_v57 = vmul.u32 %v109_v52, %v106_v47  ;;  %v112_v58 = vmul.u32 %v108_v51, %v107_v48  ;;  %v113_v62 = vmul.u32 %v109_v52, %v107_v48 }
  0x30   :  { %v136_v2 = vshll.u32 %v133_v60, 16  ;;  %v138_v3 = vshll.u32 %v134_v61, 16  ;;  %v137_v16 = vshrl.u32 %v133_v60, 16  ;;  %v139_v23 = vshrl.u32 %v134_v61, 16 }
  0x31   :  { %v114_v63 = vshll.u32 %v111_v57, 16  ;;  %v116_v0 = vshll.u32 %v112_v58, 16  ;;  %v115_v12 = vshrl.u32 %v111_v57, 16  ;;  %v117_v20 = vshrl.u32 %v112_v58, 16 }
  0x32   :  { %vm140_vm6 = vc.u32 %v132_v59, %v136_v2  ;;  %v142_v11 = vadd.s32 %v136_v2, %v132_v59 }
  0x33   :  { %vm118_vm5 = vc.u32 %v110_v56, %v114_v63  ;;  %v120_v5 = vadd.s32 %v114_v63, %v110_v56  ;;  %v141_v14 = vsel %vm140_vm6, 1, %v332_v8 }
  0x34   :  { %v119_v9 = vsel %vm118_vm5, 1, %v332_v8  ;;  %v143_v18 = vadd.s32 %v141_v14, %v135_v1  ;;  %vm144_vm8 = vc.u32 %v142_v11, %v138_v3  ;;  %v146_v26 = vadd.s32 %v142_v11, %v138_v3 }
  0x35   :  { %v121_v13 = vadd.s32 %v119_v9, %v113_v62  ;;  %vm122_vm7 = vc.u32 %v120_v5, %v116_v0  ;;  %v145_v22 = vsel %vm144_vm8, 1, %v332_v8 }
  0x36   :  { %v123_v15 = vsel %vm122_vm7, 1, %v332_v8  ;;  %v147_v24 = vadd.s32 %v145_v22, %v143_v18 }
  0x37   :  { %v125_v21 = vadd.s32 %v123_v15, %v121_v13 }
  0x38   :  { %v148_v28 = vadd.s32 %v147_v24, %v137_v16 }
  0x39   :  { %v126_v25 = vadd.s32 %v125_v21, %v115_v12 }
  0x3a   :  { %v149_v30 = vadd.s32 %v148_v28, %v139_v23 }
  0x3b   :  { %v127_v29 = vadd.s32 %v126_v25, %v117_v20 }
  0x3c   :  { %v153_v32 = vadd.s32 1, %v149_v30 }
  0x3d   :  { %vm152_vm9 = vc.u32 %v127_v29, %v146_v26  ;;  %v151_v17 = vadd.s32 %v146_v26, %v127_v29 }
  0x3e   :  { %v154_v33 = vsel %vm152_vm9, %v153_v32, %v149_v30 }
  0x3f   :  { %v155_v34 = vadd.s32 %v154_v33, %v150_v31 }
  0x41   :  { %v156_v36 = vadd.s32 536870912, %v155_v34 }
  0x43   :  { %v157_v37 = vshrl.u32 %v156_v36, 30 }
  0x45   :  { %v158_v38 = vshll.u32 %v157_v37, 30  ;;  %v181_v55 = vsub.s32 4, %v157_v37 }
  0x47   :  { %v159_v39 = vsub.s32 %v155_v34, %v158_v38  ;;  %v182_v58 = vsel %vm59_vm12, %v181_v55, %v157_v37 }
  0x48   :  { %v184_v61 = vsel %vm58_vm13, 0, %v182_v58 }
  0x49   :  { %vm160_vm10 = vcmp.lt.s32.totalorder %v159_v39, 0  ;;  %v161_v40 = vsub.s32 0, %v159_v39  ;;  %v201_v2 = vadd.s32 3, %v184_v61 }
  0x4b   :  { %v162_v41 = vsel %vm160_vm10, %v161_v40, %v159_v39  ;;  %v202_v8 = vand.u32 3, %v201_v2 }
  0x4c   :  { %v163_v42 = vclz %v162_v41 }
  0x4d   :  { %vm207_vm14 = vcmp.eq.s32.totalorder %v202_v8, 2  ;;  %vm204_vm15 = vcmp.eq.s32.totalorder %v202_v8, 0  ;;  %vm203_vm0 = vcmp.lt.s32.totalorder %v202_v8, 2 }
  0x4e   :  { %v232_v43 = vadd.s32 4294967294, %v163_v42 }
  0x50   :  { %vm233_vm11 = vcmp.lt.s32.totalorder %v232_v43, 0 }
  0x51   :  { %v166_v44 = vsel %vm233_vm11, 0, %v232_v43 }
  0x52   :  { %v167_v45 = vsub.s32 32, %v166_v44  ;;  %v168_v46 = vshll.u32 %v159_v39, %v166_v44  ;;  %v171_v47 = vsub.s32 4294967266, %v166_v44 }
  0x54   :  { %v169_v35 = vshrl.u32 %v151_v17, %v167_v45  ;;  %v172_v48 = vadd.s32 127, %v171_v47 }
  0x56   :  { %v170_v49 = vor.u32 %v169_v35, %v168_v46  ;;  %v173_v50 = vshll.u32 %v172_v48, 23 }
  0x58   :  { %v174_v51 = vor.u32 4788187, %v173_v50  ;;  %v177_v52 = vcvt.s32.f32 %v170_v49 }
  0x5a   :  { %v175_v53 = vand.u32 2147483647, %v174_v51 }
  0x5c   :  { %v178_v54 = vmul.f32 %v177_v52, %v175_v53 }
  0x5e   :  { %v179_v56 = vxor.u32 2147483648, %v178_v54 }
  0x60   :  { %v180_v57 = vsel %vm59_vm12, %v179_v56, %v178_v54 }
  0x61   :  { %v183_v59 = vsel %vm58_vm13, %v355_v7, %v180_v57 }
  0x62   :  { %v185_v60 = vmul.f32 %v183_v59, %v183_v59 }
  0x64   :  { %v186_v62 = vmul.f32 -0.001358992, %v185_v60  ;;  %v193_v63 = vmul.f32 -0.00019511016, %v185_v60 }
  0x66   :  { %v187_v0 = vadd.f32 0.041655596, %v186_v62  ;;  %v194_v1 = vadd.f32 0.008332121, %v193_v63 }
  0x68   :  { %v188_v3 = vmul.f32 %v187_v0, %v185_v60  ;;  %v195_v4 = vmul.f32 %v194_v1, %v185_v60 }
  0x6a   :  { %v189_v5 = vadd.f32 -0.4999988, %v188_v3  ;;  %v196_v6 = vadd.f32 -0.16666654, %v195_v4 }
  0x6c   :  { %v190_v9 = vmul.f32 %v189_v5, %v185_v60  ;;  %v197_v11 = vmul.f32 %v196_v6, %v185_v60 }
  0x6e   :  { %v191_v10 = vadd.f32 1.0, %v190_v9  ;;  %v198_v12 = vadd.f32 1.0, %v197_v11 }
  0x70   :  { %v199_v13 = vmul.f32 %v198_v12, %v183_v59  ;;  %v208_v14 = vxor.u32 2147483648, %v191_v10 }
  0x72   :  { %v205_v15 = vxor.u32 2147483648, %v199_v13  ;;  %v209_v16 = vsel %vm207_vm14, %v208_v14, %v199_v13 }
  0x74   :  { %v206_v18 = vsel %vm204_vm15, %v191_v10, %v205_v15 }
  0x75   :  { %v210_v19 = vsel %vm203_vm0, %v206_v18, %v209_v16 }
  0x76   :  { %v211_v20 = vsel %vm200_vm1, nan, %v210_v19 }
  0x77   :  { %212 = vst [vmem:[#allocation7] sm:$0x3] %v211_v20 }
  0x78   :  { %223 = dma.vmem_to_hbm [thread:$0]  %s219_s1, 32, %s221_s21, [#allocation4]  }
  0x79   :  { %322 = dma.done.wait [#allocation4], 32  }
  0x7a   :  { %323 = vsyncadd [#allocation4], 4294967264 }
  0x7b   :  { %228 = vsyncpa [#allocation3], 1 }
  0x7c   :  { %229 = vsyncpa [#allocation6], 1 }
  0x7d   :  { %230 = vsyncpa [#allocation4], 1 }

</bundles_post_ra>
